<compile_context>
chip_gen: v7x
topology: tpu7x:2x2x1
jax: 0.10.0
libtpu: 0.0.40
codegen_flags: <defaults>
</compile_context>

<pallas_src>
import functools

import jax
import jax.numpy as jnp
from jax.experimental import pallas as pl
from jax.experimental.pallas import tpu as pltpu


def ghost_kernel(x_ref, w1_ref, b1_ref, w2_ref, b2_ref, o_ref,
                 *, init_ch, keep2, relu):
    """One grid step = one batch row: x tile (Cin, L) -> out tile (n_keep, L)."""
    x = x_ref[...]                                                # (Cin, L) bf16

    # ---- primary conv: 1x1 conv == one channel matmul on the MXU
    #      (BN1 scale already folded into w1, bf16 x bf16 -> f32 acc) ----
    x1 = jnp.dot(w1_ref[...], x, preferred_element_type=jnp.float32)  # (init_ch, L) f32
    x1 = x1 + b1_ref[...]                                         # folded BN1 bias
    if relu:
        x1 = jnp.maximum(x1, 0.0)
    # NOTE: when init_ch % 8 != 0 this pair of stores straddles an (8,128) tile
    # (correct, slightly slower); the example config (init_ch=8) is aligned.
    o_ref[:init_ch, :] = x1.astype(o_ref.dtype)                   # first half of output

    # ---- cheap op: depthwise conv k=3, pad=1, only on the kept channels
    #      (BN2 scale folded into w2); rolls use the XLU slot ----
    x1k = x1[:keep2, :]                                           # (keep2, L) f32
    L = x1k.shape[1]
    col = jax.lax.broadcasted_iota(jnp.int32, (1, L), 1)          # lane index 0..L-1
    x1_lm1 = jnp.where(col == 0, 0.0, pltpu.roll(x1k, 1, axis=1))          # x1[l-1], zero pad
    x1_lp1 = jnp.where(col == L - 1, 0.0, pltpu.roll(x1k, L - 1, axis=1))  # x1[l+1], zero pad
    w2 = w2_ref[...]                                              # (keep2, 3) f32
    x2 = w2[:, 0:1] * x1_lm1 + w2[:, 1:2] * x1k + w2[:, 2:3] * x1_lp1
    x2 = x2 + b2_ref[...]                                         # folded BN2 bias
    if relu:
        x2 = jnp.maximum(x2, 0.0)
    o_ref[init_ch:, :] = x2.astype(o_ref.dtype)                   # second half of output


def _fold_bn(gamma, beta, mean, var, eps=1e-5):
    scale = gamma / jnp.sqrt(var + eps)
    bias = beta - mean * scale
    return (scale.reshape(-1, 1).astype(jnp.float32),
            bias.reshape(-1, 1).astype(jnp.float32))


def ghost_module_forward(x, w1, bn1, w2, bn2, *, relu=True, eps=1e-5,
                         io_dtype=jnp.bfloat16):
    """x: (B, Cin, L). w1: (init_ch, Cin) 1x1 conv weight.
    w2: (cheap_ch, 3) depthwise conv weight. bn1/bn2: (gamma, beta, mean, var).
    Returns (B, min(Cin, init_ch + cheap_ch), L) in `io_dtype`."""
    B, Cin, L = x.shape
    init_ch = w1.shape[0]
    cheap_ch = w2.shape[0]
    assert cheap_ch == init_ch, "kernel assumes ratio=2 style config (depthwise cheap op)"
    # TODO(synk): general ratio (channel replication in the grouped conv / x2 zero-pad path) not handled.
    n_keep = min(Cin, init_ch + cheap_ch)
    keep2 = n_keep - init_ch
    assert keep2 >= 1, "TODO(synk): Cin <= init_channels (x2 fully discarded) not handled"

    # Fold eval-mode BatchNorm into the conv weights (scale) + per-channel bias.
    s1, b1 = _fold_bn(*bn1, eps=eps)                    # (init_ch, 1) each
    s2, b2 = _fold_bn(*bn2, eps=eps)                    # (cheap_ch, 1) each
    w1f = (w1 * s1).astype(io_dtype)                    # bf16 weight feeds the MXU
    w2f = (w2 * s2)[:keep2].astype(jnp.float32)         # only the kept x2 channels
    b2k = b2[:keep2]

    x_io = x.astype(io_dtype)                           # bf16 HBM input, natural layout

    # VMEM accounting: double-buffered I/O tiles + in-kernel f32 temporaries + weights.
    itemsize = jnp.dtype(io_dtype).itemsize
    io_bytes = 2 * (Cin * L + n_keep * L) * itemsize                  # double-buffered x / out blocks
    tmp_bytes = (init_ch + 4 * keep2 + 2) * L * 4                     # x1, x1k, rolls, x2, iota/mask
    w_bytes = (init_ch * Cin) * itemsize + (init_ch + 4 * keep2) * 4
    vmem_est = io_bytes + tmp_bytes + w_bytes
    assert vmem_est <= (48 << 20), \
        "TODO(synk): L-tiling fallback (with 1-column halo) needed for very long sequences"
    vmem_limit = int(min(max(2 * vmem_est, 32 << 20), 48 << 20))      # safe on v7x (64 MiB phys)

    kernel = functools.partial(ghost_kernel, init_ch=init_ch, keep2=keep2, relu=relu)

    out = pl.pallas_call(
        kernel,
        out_shape=jax.ShapeDtypeStruct((B, n_keep, L), io_dtype),
        grid=(B,),
        in_specs=[
            pl.BlockSpec((pl.Squeezed(), Cin, L), lambda b: (b, 0, 0)),   # x, one batch per step
            pl.BlockSpec((init_ch, Cin), lambda b: (0, 0)),               # folded 1x1 conv weight (bf16)
            pl.BlockSpec((init_ch, 1), lambda b: (0, 0)),                 # folded BN1 bias (f32)
            pl.BlockSpec((keep2, 3), lambda b: (0, 0)),                   # folded depthwise weight (f32)
            pl.BlockSpec((keep2, 1), lambda b: (0, 0)),                   # folded BN2 bias (f32)
        ],
        out_specs=pl.BlockSpec((pl.Squeezed(), n_keep, L), lambda b: (b, 0, 0)),
        compiler_params=pltpu.CompilerParams(
            dimension_semantics=("parallel",),
            vmem_limit_bytes=vmem_limit),
    )(x_io, w1f, b1, w2f, b2k)
    return out


def _reference(x, w1, bn1, w2, bn2, n_keep, relu=True, eps=1e-5):
    """Pure-JAX f32 reference following the PyTorch module (eval-mode BN, unfolded)."""
    g1, be1, m1, v1 = bn1
    g2, be2, m2, v2 = bn2
    x1 = jnp.einsum("oc,bcl->bol", w1, x)
    x1 = (x1 - m1[None, :, None]) / jnp.sqrt(v1[None, :, None] + eps) \
         * g1[None, :, None] + be1[None, :, None]
    if relu:
        x1 = jnp.maximum(x1, 0.0)
    xp = jnp.pad(x1, ((0, 0), (0, 0), (1, 1)))
    x2 = (w2[None, :, 0:1] * xp[:, :, :-2]
          + w2[None, :, 1:2] * xp[:, :, 1:-1]
          + w2[None, :, 2:3] * xp[:, :, 2:])
    x2 = (x2 - m2[None, :, None]) / jnp.sqrt(v2[None, :, None] + eps) \
         * g2[None, :, None] + be2[None, :, None]
    if relu:
        x2 = jnp.maximum(x2, 0.0)
    out = jnp.concatenate([x1, x2], axis=1)
    return out[:, :n_keep, :]


if __name__ == "__main__":
    # Module config: GhostModule(in_channels=12, out_channels=16, ratio=2, k=1, dw=3)
    B, Cin, L = 2, 12, 128
    Cout = 16
    init_ch = max(1, Cout // 2)          # 8
    cheap_ch = Cout - init_ch            # 8

    key = jax.random.PRNGKey(0)
    k = jax.random.split(key, 12)

    x = jax.random.normal(k[0], (B, Cin, L), dtype=jnp.float32)

    # primary conv weight: Conv1d(Cin, init_ch, kernel_size=1) -> (init_ch, Cin)
    w1 = 0.2 * jax.random.normal(k[1], (init_ch, Cin), dtype=jnp.float32)
    # cheap op weight: depthwise Conv1d(init_ch, cheap_ch, 3, groups=init_ch) -> (cheap_ch, 3)
    w2 = 0.2 * jax.random.normal(k[2], (cheap_ch, 3), dtype=jnp.float32)

    # BatchNorm parameters (eval mode), deterministic
    g1 = 1.0 + 0.1 * jax.random.normal(k[3], (init_ch,), dtype=jnp.float32)
    be1 = 0.05 * jax.random.normal(k[4], (init_ch,), dtype=jnp.float32)
    m1 = 0.1 * jax.random.normal(k[5], (init_ch,), dtype=jnp.float32)
    v1 = jax.random.uniform(k[6], (init_ch,), minval=0.5, maxval=1.5, dtype=jnp.float32)

    g2 = 1.0 + 0.1 * jax.random.normal(k[7], (cheap_ch,), dtype=jnp.float32)
    be2 = 0.05 * jax.random.normal(k[8], (cheap_ch,), dtype=jnp.float32)
    m2 = 0.1 * jax.random.normal(k[9], (cheap_ch,), dtype=jnp.float32)
    v2 = jax.random.uniform(k[10], (cheap_ch,), minval=0.5, maxval=1.5, dtype=jnp.float32)

    bn1 = (g1, be1, m1, v1)
    bn2 = (g2, be2, m2, v2)

    out = ghost_module_forward(x, w1, bn1, w2, bn2, relu=True)
    out = jax.block_until_ready(out)

    n_keep = min(Cin, init_ch + cheap_ch)
    assert out.shape == (B, n_keep, L), out.shape
    assert out.dtype == jnp.bfloat16, out.dtype

    ref = _reference(x, w1, bn1, w2, bn2, n_keep, relu=True)
    diff = jnp.abs(out.astype(jnp.float32) - ref)
    max_err = float(jnp.max(diff))
    mean_err = float(jnp.mean(diff))
    # Error floor is bf16 I/O quantization (input, folded 1x1 weight and output
    # stores are bf16); the in-kernel math is f32.
    assert max_err < 5e-2, max_err
    assert mean_err < 1e-2, mean_err

    print("KERNEL_OK")
</pallas_src>

<mosaic_0001>
module attributes {stable_mosaic.version = 11 : i64} {
  func.func @ghost_kernel(%arg0: i32, %arg1: memref<1x12x128xbf16, #tpu.memory_space<vmem>>, %arg2: memref<8x12xbf16, #tpu.memory_space<vmem>>, %arg3: memref<8x1xf32, #tpu.memory_space<vmem>>, %arg4: memref<4x3xf32, #tpu.memory_space<vmem>>, %arg5: memref<4x1xf32, #tpu.memory_space<vmem>>, %arg6: memref<1x12x128xbf16, #tpu.memory_space<vmem>>) attributes {dimension_semantics = [#tpu.dimension_semantics<parallel>], iteration_bounds = array<i64: 2>, scalar_prefetch = 0 : i64, scratch_operands = 0 : i64, tpu.core_type = #tpu.core_type<tc>, window_params = [{transform_indices = @transform_0, window_bounds = array<i64: 1, 12, 128>}, {pipeline_mode = #tpu.pipeline_mode<synchronous>, transform_indices = @transform_1, window_bounds = array<i64: 8, 12>}, {pipeline_mode = #tpu.pipeline_mode<synchronous>, transform_indices = @transform_2, window_bounds = array<i64: 8, 1>}, {pipeline_mode = #tpu.pipeline_mode<synchronous>, transform_indices = @transform_3, window_bounds = array<i64: 4, 3>}, {pipeline_mode = #tpu.pipeline_mode<synchronous>, transform_indices = @transform_4, window_bounds = array<i64: 4, 1>}, {transform_indices = @transform_5, window_bounds = array<i64: 1, 12, 128>}]} {
    %c0 = arith.constant 0 : index
    %c0_0 = arith.constant 0 : index
    %c0_1 = arith.constant 0 : index
    %0 = vector.load %arg1[%c0, %c0_0, %c0_1] : memref<1x12x128xbf16, #tpu.memory_space<vmem>>, vector<1x12x128xbf16>
    %1 = vector.shape_cast %0 : vector<1x12x128xbf16> to vector<12x128xbf16>
    %c0_2 = arith.constant 0 : index
    %c0_3 = arith.constant 0 : index
    %2 = vector.load %arg2[%c0_2, %c0_3] : memref<8x12xbf16, #tpu.memory_space<vmem>>, vector<8x12xbf16>
    %cst = arith.constant dense<0.000000e+00> : vector<8x128xf32>
    %3 = tpu.matmul %2, %1, %cst {dimension_numbers = #tpu.dot_dimension_numbers<[1], [0], [0], [1], [0, 0, 1, 1], [], []>} : vector<8x12xbf16>, vector<12x128xbf16>, vector<8x128xf32> -> vector<8x128xf32>
    %c0_4 = arith.constant 0 : index
    %c0_5 = arith.constant 0 : index
    %4 = vector.load %arg3[%c0_4, %c0_5] : memref<8x1xf32, #tpu.memory_space<vmem>>, vector<8x1xf32>
    %5 = vector.broadcast %4 : vector<8x1xf32> to vector<8x128xf32>
    %6 = arith.addf %3, %5 : vector<8x128xf32>
    %cst_6 = arith.constant 0.000000e+00 : f32
    %7 = vector.broadcast %cst_6 : f32 to vector<8x128xf32>
    %8 = arith.maximumf %6, %7 : vector<8x128xf32>
    %9 = arith.truncf %8 : vector<8x128xf32> to vector<8x128xbf16>
    %c0_7 = arith.constant 0 : index
    %c0_8 = arith.constant 0 : index
    %c0_9 = arith.constant 0 : index
    %10 = vector.load %arg6[%c0_7, %c0_8, %c0_9] : memref<1x12x128xbf16, #tpu.memory_space<vmem>>, vector<1x8x128xbf16>
    %11 = vector.shape_cast %10 : vector<1x8x128xbf16> to vector<8x128xbf16>
    %12 = vector.shape_cast %9 : vector<8x128xbf16> to vector<1x8x128xbf16>
    tpu.vector_store %arg6[%c0_7, %c0_8, %c0_9], %12 {strides = array<i32>} : memref<1x12x128xbf16, #tpu.memory_space<vmem>>, vector<1x8x128xbf16>,
    %13 = vector.extract_strided_slice %8 {offsets = [0, 0], sizes = [4, 128], strides = [1, 1]} : vector<8x128xf32> to vector<4x128xf32>
    %14 = tpu.iota {dimensions = array<i32: 1>} : vector<1x128xi32>
    %c0_i32 = arith.constant 0 : i32
    %15 = vector.broadcast %c0_i32 : i32 to vector<1x128xi32>
    %16 = arith.cmpi eq, %14, %15 : vector<1x128xi32>
    %c1_i32 = arith.constant 1 : i32
    %17 = tpu.dynamic_rotate %13 by %c1_i32 dim 1 : vector<4x128xf32>, i32 -> vector<4x128xf32>
    %cst_10 = arith.constant 0.000000e+00 : f32
    %18 = vector.shape_cast %16 : vector<1x128xi1> to vector<1x128xi1>
    %19 = vector.broadcast %18 : vector<1x128xi1> to vector<4x128xi1>
    %20 = vector.broadcast %cst_10 : f32 to vector<4x128xf32>
    %21 = arith.select %19, %20, %17 : vector<4x128xi1>, vector<4x128xf32>
    %c127_i32 = arith.constant 127 : i32
    %22 = vector.broadcast %c127_i32 : i32 to vector<1x128xi32>
    %23 = arith.cmpi eq, %14, %22 : vector<1x128xi32>
    %c127_i32_11 = arith.constant 127 : i32
    %24 = tpu.dynamic_rotate %13 by %c127_i32_11 dim 1 : vector<4x128xf32>, i32 -> vector<4x128xf32>
    %cst_12 = arith.constant 0.000000e+00 : f32
    %25 = vector.shape_cast %23 : vector<1x128xi1> to vector<1x128xi1>
    %26 = vector.broadcast %25 : vector<1x128xi1> to vector<4x128xi1>
    %27 = vector.broadcast %cst_12 : f32 to vector<4x128xf32>
    %28 = arith.select %26, %27, %24 : vector<4x128xi1>, vector<4x128xf32>
    %c0_13 = arith.constant 0 : index
    %c0_14 = arith.constant 0 : index
    %29 = vector.load %arg4[%c0_13, %c0_14] : memref<4x3xf32, #tpu.memory_space<vmem>>, vector<4x3xf32>
    %30 = vector.extract_strided_slice %29 {offsets = [0, 0], sizes = [4, 1], strides = [1, 1]} : vector<4x3xf32> to vector<4x1xf32>
    %31 = vector.broadcast %30 : vector<4x1xf32> to vector<4x128xf32>
    %32 = arith.mulf %31, %21 : vector<4x128xf32>
    %33 = vector.extract_strided_slice %29 {offsets = [0, 1], sizes = [4, 1], strides = [1, 1]} : vector<4x3xf32> to vector<4x1xf32>
    %34 = vector.broadcast %33 : vector<4x1xf32> to vector<4x128xf32>
    %35 = arith.mulf %34, %13 : vector<4x128xf32>
    %36 = arith.addf %32, %35 : vector<4x128xf32>
    %37 = vector.extract_strided_slice %29 {offsets = [0, 2], sizes = [4, 1], strides = [1, 1]} : vector<4x3xf32> to vector<4x1xf32>
    %38 = vector.broadcast %37 : vector<4x1xf32> to vector<4x128xf32>
    %39 = arith.mulf %38, %28 : vector<4x128xf32>
    %40 = arith.addf %36, %39 : vector<4x128xf32>
    %c0_15 = arith.constant 0 : index
    %c0_16 = arith.constant 0 : index
    %41 = vector.load %arg5[%c0_15, %c0_16] : memref<4x1xf32, #tpu.memory_space<vmem>>, vector<4x1xf32>
    %42 = vector.broadcast %41 : vector<4x1xf32> to vector<4x128xf32>
    %43 = arith.addf %40, %42 : vector<4x128xf32>
    %cst_17 = arith.constant 0.000000e+00 : f32
    %44 = vector.broadcast %cst_17 : f32 to vector<4x128xf32>
    %45 = arith.maximumf %43, %44 : vector<4x128xf32>
    %46 = arith.truncf %45 : vector<4x128xf32> to vector<4x128xbf16>
    %c0_18 = arith.constant 0 : index
    %c8 = arith.constant 8 : index
    %c0_19 = arith.constant 0 : index
    %47 = vector.load %arg6[%c0_18, %c8, %c0_19] : memref<1x12x128xbf16, #tpu.memory_space<vmem>>, vector<1x4x128xbf16>
    %48 = vector.shape_cast %47 : vector<1x4x128xbf16> to vector<4x128xbf16>
    %49 = vector.shape_cast %46 : vector<4x128xbf16> to vector<1x4x128xbf16>
    tpu.vector_store %arg6[%c0_18, %c8, %c0_19], %49 {strides = array<i32>} : memref<1x12x128xbf16, #tpu.memory_space<vmem>>, vector<1x4x128xbf16>,
    return
  }
  func.func @transform_0(%arg0: i32) -> (i32, i32, i32) {
    %c0_i32 = arith.constant 0 : i32
    %c0_i32_0 = arith.constant 0 : i32
    %c0_i32_1 = arith.constant 0 : i32
    return %arg0, %c0_i32, %c0_i32_0 : i32, i32, i32
  }
  func.func @transform_1(%arg0: i32) -> (i32, i32) {
    %c0_i32 = arith.constant 0 : i32
    %c0_i32_0 = arith.constant 0 : i32
    %c0_i32_1 = arith.constant 0 : i32
    return %c0_i32, %c0_i32_0 : i32, i32
  }
  func.func @transform_2(%arg0: i32) -> (i32, i32) {
    %c0_i32 = arith.constant 0 : i32
    %c0_i32_0 = arith.constant 0 : i32
    %c0_i32_1 = arith.constant 0 : i32
    return %c0_i32, %c0_i32_0 : i32, i32
  }
  func.func @transform_3(%arg0: i32) -> (i32, i32) {
    %c0_i32 = arith.constant 0 : i32
    %c0_i32_0 = arith.constant 0 : i32
    %c0_i32_1 = arith.constant 0 : i32
    return %c0_i32, %c0_i32_0 : i32, i32
  }
  func.func @transform_4(%arg0: i32) -> (i32, i32) {
    %c0_i32 = arith.constant 0 : i32
    %c0_i32_0 = arith.constant 0 : i32
    %c0_i32_1 = arith.constant 0 : i32
    return %c0_i32, %c0_i32_0 : i32, i32
  }
  func.func @transform_5(%arg0: i32) -> (i32, i32, i32) {
    %c0_i32 = arith.constant 0 : i32
    %c0_i32_0 = arith.constant 0 : i32
    %c0_i32_1 = arith.constant 0 : i32
    return %arg0, %c0_i32, %c0_i32_0 : i32, i32, i32
  }
}

</mosaic_0001>

<bundles_post_ra>
// kernel: tpu_custom_call.1
= control target key start
LH: loop header
LB: loop body
LE: loop exit
PB: predicated region body
PF: predicated region fallthrough
CT: control target
= control target key end

     0   :  { %s477_s18 = smov 0   ;;  %s509_s0 = inlined_call_operand.vmem [shape: bf16[2,12,128], index: 0, kind: input, shape index: {}]   ;;  %s510_s1 = inlined_call_operand.vmem [shape: bf16[8,12], index: 1, kind: input, shape index: {}]   ;;  %s511_s2 = inlined_call_operand.vmem [shape: f32[8,1], index: 2, kind: input, shape index: {}]   ;;  %s512_s3 = inlined_call_operand.vmem [shape: f32[4,3], index: 3, kind: input, shape index: {}]   ;;  %s513_s4 = inlined_call_operand.vmem [shape: f32[4,1], index: 4, kind: input, shape index: {}]   ;;  %s514_s5 = inlined_call_operand.vmem [shape: bf16[2,12,128], index: 5, kind: output, shape index: {}]  }
   0x1 LB: > { %s389_s19 = sadd.s32 4294967295, %s438_s18   ;;  %p393_p0 = scmp.ge.s32.totalorder %s438_s18, 1  ;;  %s438_s18 = sphi %s477_s18, %s15_s18  }
   0x2   : > { %p187_p1 = scmp.lt.s32.totalorder %s438_s18, 3 }
   0x4   : > { %p188_p2 = pnand %p393_p0, %p187_p1 }
   0x5   : > { %p215_p3 = scmp.lt.s32.totalorder (!%p188_p2), %s389_s19, 1  ;;  %v440_v0 = vmov (!%p188_p2), 0.0   ;;  %vm441_vm0 = vmmov (!%p188_p2), 0   ;;  %v229_v1 = vld [vmem:[%s511_s2] sm:$0xff] (!%p188_p2)  ;;  %v442_v2 = vmov (!%p188_p2), 0   ;;  %v443_v4 = vmov (!%p188_p2), 1  }
   0x6   : > { %191 = sbr.rel (%p188_p2) target bundleno = 368 (0x170), region = 40  ;;  %406 = vmatprep.subr.bf16.mxu0 (!%p188_p2), %v440_v0  ;;  %408 = vmatprep.mubr.msk.bf16.mxu0 (!%p188_p2), %vm441_vm0, %v440_v0  ;;  %v305_v3 = vld [vmem:[%s512_s3] sm:$0xf] (!%p188_p2)  ;;  %vm244_vm1 = vcmask (!%p188_p2), 1045504   ;;  %v444_v6 = vmov (!%p188_p2), 2   ;;  %vm240_vm2 = vcmask (!%p188_p2), 97280   ;;  %v291_v18 = vlaneseq (!%p188_p2) }
   0x7   : > { %427 = vset.pattern.permute.xlu0 (!%p188_p2), %v442_v2  ;;  %428 = vset.pattern.permute.xlu1 (!%p188_p2), %v443_v4  ;;  %v228_v8 = vld [vmem:[%s510_s1] sm:$0xf] (!%p188_p2)  ;;  %s445_s10 = smov (!%p188_p2), 1   ;;  %s446_s11 = smov (!%p188_p2), 127  }
   0x8   : > { %232 = vperm.xlu0 (!%p188_p2), %427, %v229_v1   ;;  %313 = vperm.xlu1 (!%p188_p2), %428, %v305_v3   ;;  %v324_v9 = vld [vmem:[%s513_s4] sm:$0xf] (!%p188_p2)  ;;  %v292_v19 = vand.u32 (!%p188_p2), 127, %v291_v18 }
   0xa   : > { %vm293_vm3 = vcmp.eq.s32.totalorder (!%p188_p2), %v292_v19, 0  ;;  %vm299_vm4 = vcmp.eq.s32.totalorder (!%p188_p2), %v292_v19, 127 }
   0xc   : > { %308 = vperm.xlu0 (!%p188_p2), %427, %v305_v3   ;;  %429 = vset.pattern.permute.xlu1 (!%p188_p2), %v444_v6 }
   0xd   : > { %s516_s19 = smov (!%p215_p3, %s389_s19), 1  ;;  %319 = vperm.xlu1 %429, %v305_v3  }
   0xe   : > { %s402_s24 = sshll.u32 %s516_s19, 3 }
   0xf   : > { %s219_s27 = scalar_lea.vmem %s509_s0, %s402_s24  ;;  %s224_s9 = scalar_lea.vmem %s514_s5, %s402_s24 }
  0x10   : > { %v431_v5 = vld [vmem:[%s219_s27] sm:$0x3f]  }
  0x11   : > { %v246_v7 = vsel %vm244_vm1, %v431_v5, 0  ;;  %430 = vset.pattern.permute.xlu1 %v442_v2 }
  0x12   : > { %407 = vmatpush3.bf16.msra.mxu0 %v246_v7  ;;  %327 = vperm.xlu1 %430, %v324_v9  }
  0x15   : > { %409 = vmatmul.mubr.msk.bf16.vlgmr.msra.gmra.mrb[0].mxu0 %vm240_vm2, %v228_v8 }
  0x87   : > { %v233_v10 = vpop.permute.xlu0 %232  ;;  %v314_v21 = vpop.permute.xlu1 %313 }
  0x8b   : > { %v309_v20 = vpop.permute.xlu0 %308 }
  0x8c   : > { %v320_v24 = vpop.permute.xlu1 %319 }
  0x91   : > { %v328_v31 = vpop.permute.xlu1 %327 }
  0xe8   : > { %v282_v11 = vpop.f32.mrb[0].mxu0 }
  0xe9   : > { %v283_v12 = vadd.f32 %v282_v11, %v233_v10  ;;  %v410_v13 = vpop.f32.mrb[1].mxu0 }
  0xea   : > { %v285_v14 = vpop.f32.mrb[2].mxu0 }
  0xeb   : > { %v288_v15 = vmax.f32 %v283_v12, 0.0  ;;  %v411_v16 = vpop.f32.mrb[3].mxu0 }
  0xed   : > { %294 = vrot.lane.b32.xlu0 %v288_v15, %s445_s10  ;;  %v289_v17 = vpack.c.bf16 %v288_v15, %v288_v15  ;;  %v316_v26 = vmul.f32 %v314_v21, %v288_v15 }
  0xef   : > { %290 = vst [vmem:[%s224_s9] sm:$0xf] %v289_v17 }
  0xf1   : > { %300 = vrot.lane.b32.xlu0 %v288_v15, %s446_s11 }
 0x15f   : > { %v295_v22 = vpop.permute.xlu0 %294 }
 0x160   : > { %v298_v23 = vsel %vm293_vm3, 0.0, %v295_v22 }
 0x161   : > { %v311_v25 = vmul.f32 %v309_v20, %v298_v23 }
 0x163   : > { %v301_v27 = vpop.permute.xlu0 %300  ;;  %v317_v29 = vadd.f32 %v316_v26, %v311_v25 }
 0x164   : > { %v304_v28 = vsel %vm299_vm4, 0.0, %v301_v27 }
 0x165   : > { %v322_v30 = vmul.f32 %v320_v24, %v304_v28 }
 0x167   : > { %v323_v32 = vadd.f32 %v322_v30, %v317_v29 }
 0x169   : > { %v330_v33 = vadd.f32 %v328_v31, %v323_v32 }
 0x16b   : > { %v331_v34 = vmax.f32 %v330_v33, 0.0 }
 0x16d   : > { %v332_v35 = vpack.c.bf16 %v331_v34, %v331_v34 }
 0x16f   : > { %333 = vst [vmem:[%s224_s9 + $0x4] sm:$0x3] %v332_v35 }
 0x170 PF: > { %s15_s18 = sadd.s32 1, %s438_s18  }
 0x171   : > { %p12_p4 = scmp.ge.s32.totalorder %s15_s18, 4  }
 0x173   :  { %14 = sbr.rel (!%p12_p4) target bundleno = 1 (0x1), region = 70 }

</bundles_post_ra>
